<compile_context>
chip_gen: v6e
topology: v6e:2x2x1
jax: 0.10.0
libtpu: 0.0.40
codegen_flags: <defaults>
</compile_context>

<pallas_src>
import functools

import numpy as np

import jax
import jax.numpy as jnp
from jax.experimental import pallas as pl
from jax.experimental.pallas import tpu as pltpu


def _round_up(n, m):
    return ((n + m - 1) // m) * m


# ----------------------------------------------------------------------------
# Kernel (feature-major: features on sublanes, batch on lanes)
# ----------------------------------------------------------------------------
def naf_kernel(x_ref, u_ref, w1_ref, w2_ref, wh_ref, b_ref, slow_ref, rlow_ref,
               qv_ref, *, hidden, hp, head_pad, a8, l8, n_low,
               off_mu, off_diag, off_low):
    xT = x_ref[...]                              # [D,  TB]
    uT = u_ref[...]                              # [A8, TB]  (rows >= A are zero)

    b1 = b_ref[0:hidden, :]                      # [H, 1]
    b2 = b_ref[hp:hp + hidden, :]                # [H, 1]
    bh = b_ref[2 * hp:2 * hp + head_pad, :]      # [head_pad, 1]

    # x = tanh(linear1(x)); x = tanh(linear2(x))  -- all [feat, TB]
    h1 = jnp.tanh(jnp.dot(w1_ref[...], xT, preferred_element_type=jnp.float32) + b1)
    h2 = jnp.tanh(jnp.dot(w2_ref[...], h1, preferred_element_type=jnp.float32) + b2)

    # Fused head: rows [V:8 | mu:A8 | L_diag:A8 | L_lower:L8] (padded rows are zero).
    head = jnp.dot(wh_ref[...], h2, preferred_element_type=jnp.float32) + bh

    V = head[0:1, :]                                       # [1,  TB]
    mu = jnp.tanh(head[off_mu:off_mu + a8, :])             # [A8, TB]
    d = jnp.exp(head[off_diag:off_diag + a8, :])           # [A8, TB]  exp ONLY on diag
    u_mu = uT - mu                                         # [A8, TB]

    # y = L^T (u - mu):  diag part elementwise, strictly-lower part via 0/1 matmuls.
    y = d * u_mu
    if n_low > 0:
        low = head[off_low:off_low + l8, :]                # [L8, TB]
        u_rep = jnp.dot(slow_ref[...], u_mu,
                        preferred_element_type=jnp.float32)        # [L8, TB]
        y = y + jnp.dot(rlow_ref[...], low * u_rep,
                        preferred_element_type=jnp.float32)        # [A8, TB]

    acc = jnp.sum(y * y, axis=0, keepdims=True)            # [1, TB]
    Q = V - 0.5 * acc                                      # [1, TB]

    qv_ref[0:1, :] = Q
    qv_ref[1:2, :] = V


# ----------------------------------------------------------------------------
# Wrapper
# ----------------------------------------------------------------------------
def naf_forward(x, u, params, *, n_actions, tile_b=None):
    B, D = x.shape
    H = params["w1"].shape[1]
    A = n_actions
    n_low = A * (A - 1) // 2

    A8 = _round_up(max(A, 1), 8)
    L8 = _round_up(max(n_low, 1), 8)
    hp = _round_up(H, 8)
    head_pad = 8 + 2 * A8 + L8
    off_mu, off_diag, off_low = 8, 8 + A8, 8 + 2 * A8

    # --- tile / grid selection: >=2 parallel blocks on multi-TC chips, else 1 block ---
    if tile_b is None:
        try:
            kind = jax.devices()[0].device_kind.lower()
        except Exception:
            kind = ""
        multi_tc = any(t in kind for t in ("v4", "v5p", "v7"))
        if multi_tc and B > 128:
            tile_b = 128
        else:
            tile_b = min(_round_up(B, 128), 1024)
    Bp = _round_up(B, tile_b)

    # --- host-side layout prep (one-time, cheap XLA ops) ---
    xT = jnp.pad(x, ((0, Bp - B), (0, 0))).T                    # [D,  Bp]
    uT = jnp.pad(u, ((0, Bp - B), (0, A8 - A))).T               # [A8, Bp]

    w1t = params["w1"].T                                        # [H, D]
    w2t = params["w2"].T                                        # [H, H]

    wv, bv = params["wv"], params["bv"]
    wmu, bmu = params["wmu"], params["bmu"]
    wl, bl = params["wl"], params["bl"]

    diag_idx = np.array([i * A + i for i in range(A)])
    low_pairs = [(i, j) for i in range(A) for j in range(i)]    # i > j
    low_idx = np.array([i * A + j for (i, j) in low_pairs], dtype=np.int64)

    def padc(m, w):
        return jnp.pad(m, ((0, 0), (0, w - m.shape[1])))

    wl_d, bl_d = wl[:, diag_idx], bl[:, diag_idx]
    if n_low > 0:
        wl_l, bl_l = wl[:, low_idx], bl[:, low_idx]
    else:
        wl_l = jnp.zeros((H, 0), jnp.float32)
        bl_l = jnp.zeros((1, 0), jnp.float32)

    # Fused, reordered, sublane-aligned head: [V:8 | mu:A8 | L_diag:A8 | L_lower:L8].
    wh = jnp.concatenate([padc(wv, 8), padc(wmu, A8), padc(wl_d, A8), padc(wl_l, L8)], axis=1)
    bh = jnp.concatenate([padc(bv, 8), padc(bmu, A8), padc(bl_d, A8), padc(bl_l, L8)], axis=1)
    wht = wh.T                                                  # [head_pad, H]

    # Pack all biases into one slab: rows [b1 | b2 | bh].
    bcat = jnp.concatenate([
        jnp.pad(params["b1"].T, ((0, hp - H), (0, 0))),
        jnp.pad(params["b2"].T, ((0, hp - H), (0, 0))),
        bh.T,
    ], axis=0)                                                  # [2*hp + head_pad, 1]

    # Constant 0/1 gather / scatter-reduce matrices for the strictly-lower entries.
    slow_np = np.zeros((L8, A8), np.float32)                    # row p -> u_mu[i_p]
    rlow_np = np.zeros((A8, L8), np.float32)                    # reduce p into y[j_p]
    for p, (i, j) in enumerate(low_pairs):
        slow_np[p, i] = 1.0
        rlow_np[j, p] = 1.0
    slow = jnp.asarray(slow_np)
    rlow = jnp.asarray(rlow_np)

    kernel = functools.partial(
        naf_kernel, hidden=H, hp=hp, head_pad=head_pad, a8=A8, l8=L8,
        n_low=n_low, off_mu=off_mu, off_diag=off_diag, off_low=off_low)

    grid = (Bp // tile_b,)
    batch_spec = lambda rows: pl.BlockSpec((rows, tile_b), lambda b: (0, b))
    const_spec = lambda shape: pl.BlockSpec(shape, lambda b: (0, 0))

    qv = pl.pallas_call(
        kernel,
        out_shape=jax.ShapeDtypeStruct((2, Bp), jnp.float32),   # row 0 = Q, row 1 = V
        grid=grid,
        in_specs=[
            batch_spec(D),                       # xT
            batch_spec(A8),                      # uT
            const_spec((H, D)),                  # w1^T
            const_spec((H, H)),                  # w2^T
            const_spec((head_pad, H)),           # fused head weight^T
            const_spec((2 * hp + head_pad, 1)),  # packed biases
            const_spec((L8, A8)),                # slow (gather)
            const_spec((A8, L8)),                # rlow (scatter-reduce)
        ],
        out_specs=pl.BlockSpec((2, tile_b), lambda b: (0, b)),
        compiler_params=pltpu.CompilerParams(dimension_semantics=("parallel",)),
    )(xT, uT, w1t, w2t, wht, bcat, slow, rlow)

    Q = qv[0, :B][:, None]
    V = qv[1, :B][:, None]
    # When actions are supplied, the returned 'actions' is just the input actions.
    return {"Q": Q, "V": V, "actions": u}


# ----------------------------------------------------------------------------
# Deterministic parameter construction (mimics nn.Linear init + 0.1 scaling)
# ----------------------------------------------------------------------------
def init_params(key, num_inputs, hidden, n_actions):
    def linear(key, fan_in, fan_out, scale=1.0):
        kw, kb = jax.random.split(key)
        bound = 1.0 / jnp.sqrt(fan_in)
        w = jax.random.uniform(kw, (fan_in, fan_out), jnp.float32, -bound, bound) * scale
        b = jax.random.uniform(kb, (1, fan_out), jnp.float32, -bound, bound) * scale
        return w, b

    keys = jax.random.split(key, 5)
    w1, b1 = linear(keys[0], num_inputs, hidden)
    w2, b2 = linear(keys[1], hidden, hidden)
    wv, bv = linear(keys[2], hidden, 1, scale=0.1)
    wmu, bmu = linear(keys[3], hidden, n_actions, scale=0.1)
    wl, bl = linear(keys[4], hidden, n_actions ** 2, scale=0.1)

    A = n_actions
    ones = jnp.ones((A, A), jnp.float32)
    tril = jnp.tril(ones, k=-1).reshape(1, A * A)           # strictly-lower mask
    diag = jnp.eye(A, dtype=jnp.float32).reshape(1, A * A)  # diagonal mask

    return dict(w1=w1, b1=b1, w2=w2, b2=b2, wv=wv, bv=bv,
                wmu=wmu, bmu=bmu, wl=wl, bl=bl, tril=tril, diag=diag)


# ----------------------------------------------------------------------------
# Pure-JAX reference (mirrors the PyTorch forward, msg_pass=False, actions given)
# ----------------------------------------------------------------------------
def naf_reference(x, u, params, n_actions):
    h1 = jnp.tanh(x @ params["w1"] + params["b1"])
    h2 = jnp.tanh(h1 @ params["w2"] + params["b2"])
    V = h2 @ params["wv"] + params["bv"]
    mu = jnp.tanh(h2 @ params["wmu"] + params["bmu"])
    A = n_actions
    L = (h2 @ params["wl"] + params["bl"]).reshape(-1, A, A)
    tril = params["tril"].reshape(A, A)[None]
    diag = params["diag"].reshape(A, A)[None]
    L = L * tril + jnp.exp(L) * diag
    P = jnp.einsum("bij,bkj->bik", L, L)
    u_mu = u - mu
    Aval = -0.5 * jnp.einsum("bi,bij,bj->b", u_mu, P, u_mu)[:, None]
    return {"Q": Aval + V, "V": V, "actions": u}


# TODO(synk): msg_pass=True branch (recurrent MLPBase message passing over agents)
# and the actions=None branch (Q = V, actions = mu.detach()) are not implemented;
# this kernel covers the msg_pass=False forward path with actions provided.

if __name__ == "__main__":
    B = 250            # batch (flattened bs * n_agents); NOT a multiple of 128 on purpose
    D = 32             # input_shape
    H = 32             # args.naf_hidden_dim
    A = 4              # args.n_actions

    key = jax.random.PRNGKey(0)
    k_par, k_x, k_u = jax.random.split(key, 3)

    params = init_params(k_par, D, H, A)
    x = jax.random.normal(k_x, (B, D), jnp.float32)
    u = jax.random.normal(k_u, (B, A), jnp.float32)

    out = naf_forward(x, u, params, n_actions=A)
    jax.block_until_ready(out)

    ref = naf_reference(x, u, params, A)
    assert jnp.allclose(out["Q"], ref["Q"], atol=1e-4, rtol=1e-4)
    assert jnp.allclose(out["V"], ref["V"], atol=1e-4, rtol=1e-4)
    assert jnp.allclose(out["actions"], ref["actions"], atol=1e-6)

    print("KERNEL_OK")
</pallas_src>

<mosaic_0001>
module attributes {stable_mosaic.version = 11 : i64} {
  func.func @naf_kernel(%arg0: i32, %arg1: memref<32x256xf32, #tpu.memory_space<vmem>>, %arg2: memref<8x256xf32, #tpu.memory_space<vmem>>, %arg3: memref<32x32xf32, #tpu.memory_space<vmem>>, %arg4: memref<32x32xf32, #tpu.memory_space<vmem>>, %arg5: memref<32x32xf32, #tpu.memory_space<vmem>>, %arg6: memref<96x1xf32, #tpu.memory_space<vmem>>, %arg7: memref<8x8xf32, #tpu.memory_space<vmem>>, %arg8: memref<8x8xf32, #tpu.memory_space<vmem>>, %arg9: memref<2x256xf32, #tpu.memory_space<vmem>>) attributes {dimension_semantics = [#tpu.dimension_semantics<parallel>], iteration_bounds = array<i64: 1>, scalar_prefetch = 0 : i64, scratch_operands = 0 : i64, tpu.core_type = #tpu.core_type<tc>, window_params = [{transform_indices = @transform_0, window_bounds = array<i64: 32, 256>}, {transform_indices = @transform_1, window_bounds = array<i64: 8, 256>}, {pipeline_mode = #tpu.pipeline_mode<synchronous>, transform_indices = @transform_2, window_bounds = array<i64: 32, 32>}, {pipeline_mode = #tpu.pipeline_mode<synchronous>, transform_indices = @transform_3, window_bounds = array<i64: 32, 32>}, {pipeline_mode = #tpu.pipeline_mode<synchronous>, transform_indices = @transform_4, window_bounds = array<i64: 32, 32>}, {pipeline_mode = #tpu.pipeline_mode<synchronous>, transform_indices = @transform_5, window_bounds = array<i64: 96, 1>}, {pipeline_mode = #tpu.pipeline_mode<synchronous>, transform_indices = @transform_6, window_bounds = array<i64: 8, 8>}, {pipeline_mode = #tpu.pipeline_mode<synchronous>, transform_indices = @transform_7, window_bounds = array<i64: 8, 8>}, {transform_indices = @transform_8, window_bounds = array<i64: 2, 256>}]} {
    %c0 = arith.constant 0 : index
    %c0_0 = arith.constant 0 : index
    %0 = vector.load %arg1[%c0, %c0_0] : memref<32x256xf32, #tpu.memory_space<vmem>>, vector<32x256xf32>
    %c0_1 = arith.constant 0 : index
    %c0_2 = arith.constant 0 : index
    %1 = vector.load %arg2[%c0_1, %c0_2] : memref<8x256xf32, #tpu.memory_space<vmem>>, vector<8x256xf32>
    %c0_3 = arith.constant 0 : index
    %c0_4 = arith.constant 0 : index
    %2 = vector.load %arg6[%c0_3, %c0_4] : memref<96x1xf32, #tpu.memory_space<vmem>>, vector<32x1xf32>
    %c32 = arith.constant 32 : index
    %c0_5 = arith.constant 0 : index
    %3 = vector.load %arg6[%c32, %c0_5] : memref<96x1xf32, #tpu.memory_space<vmem>>, vector<32x1xf32>
    %c64 = arith.constant 64 : index
    %c0_6 = arith.constant 0 : index
    %4 = vector.load %arg6[%c64, %c0_6] : memref<96x1xf32, #tpu.memory_space<vmem>>, vector<32x1xf32>
    %c0_7 = arith.constant 0 : index
    %c0_8 = arith.constant 0 : index
    %5 = vector.load %arg3[%c0_7, %c0_8] : memref<32x32xf32, #tpu.memory_space<vmem>>, vector<32x32xf32>
    %cst = arith.constant dense<0.000000e+00> : vector<32x256xf32>
    %6 = tpu.matmul %5, %0, %cst {dimension_numbers = #tpu.dot_dimension_numbers<[1], [0], [0], [1], [0, 0, 1, 1], [], []>} : vector<32x32xf32>, vector<32x256xf32>, vector<32x256xf32> -> vector<32x256xf32>
    %7 = vector.broadcast %2 : vector<32x1xf32> to vector<32x256xf32>
    %8 = arith.addf %6, %7 : vector<32x256xf32>
    %9 = math.tanh %8 : vector<32x256xf32>
    %c0_9 = arith.constant 0 : index
    %c0_10 = arith.constant 0 : index
    %10 = vector.load %arg4[%c0_9, %c0_10] : memref<32x32xf32, #tpu.memory_space<vmem>>, vector<32x32xf32>
    %cst_11 = arith.constant dense<0.000000e+00> : vector<32x256xf32>
    %11 = tpu.matmul %10, %9, %cst_11 {dimension_numbers = #tpu.dot_dimension_numbers<[1], [0], [0], [1], [0, 0, 1, 1], [], []>} : vector<32x32xf32>, vector<32x256xf32>, vector<32x256xf32> -> vector<32x256xf32>
    %12 = vector.broadcast %3 : vector<32x1xf32> to vector<32x256xf32>
    %13 = arith.addf %11, %12 : vector<32x256xf32>
    %14 = math.tanh %13 : vector<32x256xf32>
    %c0_12 = arith.constant 0 : index
    %c0_13 = arith.constant 0 : index
    %15 = vector.load %arg5[%c0_12, %c0_13] : memref<32x32xf32, #tpu.memory_space<vmem>>, vector<32x32xf32>
    %cst_14 = arith.constant dense<0.000000e+00> : vector<32x256xf32>
    %16 = tpu.matmul %15, %14, %cst_14 {dimension_numbers = #tpu.dot_dimension_numbers<[1], [0], [0], [1], [0, 0, 1, 1], [], []>} : vector<32x32xf32>, vector<32x256xf32>, vector<32x256xf32> -> vector<32x256xf32>
    %17 = vector.broadcast %4 : vector<32x1xf32> to vector<32x256xf32>
    %18 = arith.addf %16, %17 : vector<32x256xf32>
    %19 = vector.extract_strided_slice %18 {offsets = [0, 0], sizes = [1, 256], strides = [1, 1]} : vector<32x256xf32> to vector<1x256xf32>
    %20 = vector.extract_strided_slice %18 {offsets = [8, 0], sizes = [8, 256], strides = [1, 1]} : vector<32x256xf32> to vector<8x256xf32>
    %21 = math.tanh %20 : vector<8x256xf32>
    %22 = vector.extract_strided_slice %18 {offsets = [16, 0], sizes = [8, 256], strides = [1, 1]} : vector<32x256xf32> to vector<8x256xf32>
    %23 = math.exp %22 : vector<8x256xf32>
    %24 = arith.subf %1, %21 : vector<8x256xf32>
    %25 = arith.mulf %23, %24 : vector<8x256xf32>
    %26 = vector.extract_strided_slice %18 {offsets = [24, 0], sizes = [8, 256], strides = [1, 1]} : vector<32x256xf32> to vector<8x256xf32>
    %c0_15 = arith.constant 0 : index
    %c0_16 = arith.constant 0 : index
    %27 = vector.load %arg7[%c0_15, %c0_16] : memref<8x8xf32, #tpu.memory_space<vmem>>, vector<8x8xf32>
    %cst_17 = arith.constant dense<0.000000e+00> : vector<8x256xf32>
    %28 = tpu.matmul %27, %24, %cst_17 {dimension_numbers = #tpu.dot_dimension_numbers<[1], [0], [0], [1], [0, 0, 1, 1], [], []>} : vector<8x8xf32>, vector<8x256xf32>, vector<8x256xf32> -> vector<8x256xf32>
    %c0_18 = arith.constant 0 : index
    %c0_19 = arith.constant 0 : index
    %29 = vector.load %arg8[%c0_18, %c0_19] : memref<8x8xf32, #tpu.memory_space<vmem>>, vector<8x8xf32>
    %30 = arith.mulf %26, %28 : vector<8x256xf32>
    %cst_20 = arith.constant dense<0.000000e+00> : vector<8x256xf32>
    %31 = tpu.matmul %29, %30, %cst_20 {dimension_numbers = #tpu.dot_dimension_numbers<[1], [0], [0], [1], [0, 0, 1, 1], [], []>} : vector<8x8xf32>, vector<8x256xf32>, vector<8x256xf32> -> vector<8x256xf32>
    %32 = arith.addf %25, %31 : vector<8x256xf32>
    %33 = arith.mulf %32, %32 : vector<8x256xf32>
    %cst_21 = arith.constant dense<0.000000e+00> : vector<256xf32>
    %34 = vector.multi_reduction <add>, %33, %cst_21 [0] : vector<8x256xf32> to vector<256xf32>
    %35 = vector.shape_cast %34 : vector<256xf32> to vector<1x256xf32>
    %cst_22 = arith.constant 5.000000e-01 : f32
    %36 = vector.broadcast %cst_22 : f32 to vector<1x256xf32>
    %37 = arith.mulf %36, %35 : vector<1x256xf32>
    %38 = arith.subf %19, %37 : vector<1x256xf32>
    %c0_23 = arith.constant 0 : index
    %c0_24 = arith.constant 0 : index
    %39 = vector.load %arg9[%c0_23, %c0_24] : memref<2x256xf32, #tpu.memory_space<vmem>>, vector<1x256xf32>
    tpu.vector_store %arg9[%c0_23, %c0_24], %38 {strides = array<i32>} : memref<2x256xf32, #tpu.memory_space<vmem>>, vector<1x256xf32>,
    %c1 = arith.constant 1 : index
    %c0_25 = arith.constant 0 : index
    %40 = vector.load %arg9[%c1, %c0_25] : memref<2x256xf32, #tpu.memory_space<vmem>>, vector<1x256xf32>
    tpu.vector_store %arg9[%c1, %c0_25], %19 {strides = array<i32>} : memref<2x256xf32, #tpu.memory_space<vmem>>, vector<1x256xf32>,
    return
  }
  func.func @transform_0(%arg0: i32) -> (i32, i32) {
    %c0_i32 = arith.constant 0 : i32
    %c0_i32_0 = arith.constant 0 : i32
    return %c0_i32, %arg0 : i32, i32
  }
  func.func @transform_1(%arg0: i32) -> (i32, i32) {
    %c0_i32 = arith.constant 0 : i32
    %c0_i32_0 = arith.constant 0 : i32
    return %c0_i32, %arg0 : i32, i32
  }
  func.func @transform_2(%arg0: i32) -> (i32, i32) {
    %c0_i32 = arith.constant 0 : i32
    %c0_i32_0 = arith.constant 0 : i32
    %c0_i32_1 = arith.constant 0 : i32
    return %c0_i32, %c0_i32_0 : i32, i32
  }
  func.func @transform_3(%arg0: i32) -> (i32, i32) {
    %c0_i32 = arith.constant 0 : i32
    %c0_i32_0 = arith.constant 0 : i32
    %c0_i32_1 = arith.constant 0 : i32
    return %c0_i32, %c0_i32_0 : i32, i32
  }
  func.func @transform_4(%arg0: i32) -> (i32, i32) {
    %c0_i32 = arith.constant 0 : i32
    %c0_i32_0 = arith.constant 0 : i32
    %c0_i32_1 = arith.constant 0 : i32
    return %c0_i32, %c0_i32_0 : i32, i32
  }
  func.func @transform_5(%arg0: i32) -> (i32, i32) {
    %c0_i32 = arith.constant 0 : i32
    %c0_i32_0 = arith.constant 0 : i32
    %c0_i32_1 = arith.constant 0 : i32
    return %c0_i32, %c0_i32_0 : i32, i32
  }
  func.func @transform_6(%arg0: i32) -> (i32, i32) {
    %c0_i32 = arith.constant 0 : i32
    %c0_i32_0 = arith.constant 0 : i32
    %c0_i32_1 = arith.constant 0 : i32
    return %c0_i32, %c0_i32_0 : i32, i32
  }
  func.func @transform_7(%arg0: i32) -> (i32, i32) {
    %c0_i32 = arith.constant 0 : i32
    %c0_i32_0 = arith.constant 0 : i32
    %c0_i32_1 = arith.constant 0 : i32
    return %c0_i32, %c0_i32_0 : i32, i32
  }
  func.func @transform_8(%arg0: i32) -> (i32, i32) {
    %c0_i32 = arith.constant 0 : i32
    %c0_i32_0 = arith.constant 0 : i32
    return %c0_i32, %arg0 : i32, i32
  }
}

</mosaic_0001>

<bundles_post_ra>
// kernel: tpu_custom_call.1
= control target key start
LH: loop header
LB: loop body
LE: loop exit
PB: predicated region body
PF: predicated region fallthrough
CT: control target
= control target key end

     0   :  { %13 = vsyncpa [#allocation3], 0  ;;  %s1115_s0 = inlined_call_operand.vmem [shape: f32[32,256], index: 0, kind: input, shape index: {}]   ;;  %s1116_s1 = inlined_call_operand.hbm [shape: f32[8,256], index: 1, kind: input, shape index: {}]   ;;  %s1117_s2 = inlined_call_operand.vmem [shape: f32[32,32], index: 2, kind: input, shape index: {}]   ;;  %s1118_s3 = inlined_call_operand.hbm [shape: f32[32,32], index: 3, kind: input, shape index: {}]   ;;  %s1119_s4 = inlined_call_operand.hbm [shape: f32[32,32], index: 4, kind: input, shape index: {}]   ;;  %s1120_s5 = inlined_call_operand.vmem [shape: f32[96,1], index: 5, kind: input, shape index: {}]   ;;  %s1121_s6 = inlined_call_operand.vmem [shape: f32[8,8], index: 6, kind: input, shape index: {}]   ;;  %s1122_s7 = inlined_call_operand.hbm [shape: f32[8,8], index: 7, kind: input, shape index: {}]   ;;  %s1123_s8 = inlined_call_operand.hbm [shape: f32[2,256], index: 8, kind: output, shape index: {}]  }
   0x1   :  { %14 = vsyncpa [#allocation6], 0 }
   0x2   :  { %15 = vsyncpa [#allocation9], 0 }
   0x3   :  { %16 = vsyncpa [#allocation4], 0  ;;  %s920_s27 = smov [#allocation5]  }
   0x4   :  { %s36_s28 = sshll.u32 %s920_s27, 4  ;;  %s37_s28 = int_to_ptr.vmem [resolvable:$true] %s36_s28 }
   0x5   :  { %s820_s29 = scalar_lea.vmem %s37_s28, 512  ;;  %p825_p1 = scmp.lt.s32.totalorder %s37_s28, %s37_s28 }
   0x6   :  { %p821_p0 = scmp.ne.s32.totalorder %s37_s28, %s820_s29  ;;  %p826_p2 = scmp.lt.s32.totalorder %s820_s29, %s820_s29 }
   0x8   :  { %p827_p3 = por %p826_p2, %p825_p1 }
   0xa   :  { %p828_p4 = pnand %p827_p3, %p821_p0 }
   0xc   :  { %831 = shalt.err (!%p828_p4)
}
   0xd   :  { %s921_s30 = smov 128   ;;  %s922_s9 = smov 8  }
   0xe   :  { %42 = dma.hbm_to_vmem [thread:$0]  %s1118_s3, 512, %s37_s28, [#allocation6], %s921_s30, %s921_s30, %s922_s9  }
   0xf   :  { %s923_s12 = smov [#allocation2]   ;;  %s924_s14 = smov [#allocation7]  }
  0x10   :  { %s25_s13 = sshll.u32 %s923_s12, 4  ;;  %s48_s15 = sshll.u32 %s924_s14, 4  ;;  %s26_s13 = int_to_ptr.vmem [resolvable:$true] %s25_s13  ;;  %s49_s15 = int_to_ptr.vmem [resolvable:$true] %s48_s15 }
  0x11   :  { %s840_s16 = scalar_lea.vmem %s26_s13, 256  ;;  %p845_p6 = scmp.lt.s32.totalorder %s26_s13, %s26_s13 }
  0x12   :  { %p841_p5 = scmp.ne.s32.totalorder %s26_s13, %s840_s16  ;;  %p846_p7 = scmp.lt.s32.totalorder %s840_s16, %s840_s16 }
  0x14   :  { %p847_p8 = por %p846_p7, %p845_p6 }
  0x16   :  { %p848_p9 = pnand %p847_p8, %p841_p5 }
  0x18   :  { %851 = shalt.err (!%p848_p9)
}
  0x19   :  { %28 = dma.hbm_to_vmem [thread:$0]  %s1116_s1, 256, %s26_s13, [#allocation3]  }
  0x1a   :  { %s860_s19 = scalar_lea.vmem %s49_s15, 512  ;;  %p865_p11 = scmp.lt.s32.totalorder %s49_s15, %s49_s15 }
  0x1b   :  { %p861_p10 = scmp.ne.s32.totalorder %s49_s15, %s860_s19  ;;  %p866_p12 = scmp.lt.s32.totalorder %s860_s19, %s860_s19 }
  0x1d   :  { %p867_p13 = por %p866_p12, %p865_p11 }
  0x1f   :  { %p868_p0 = pnand %p867_p13, %p861_p10 }
  0x21   :  { %871 = shalt.err (!%p868_p0)
}
  0x22   :  { %54 = dma.hbm_to_vmem [thread:$0]  %s1119_s4, 512, %s49_s15, [#allocation6], %s921_s30, %s921_s30, %s922_s9  }
  0x23   :  { %s925_s21 = smov [#allocation8]  }
  0x24   :  { %s65_s22 = sshll.u32 %s925_s21, 4  ;;  %s66_s22 = int_to_ptr.vmem [resolvable:$true] %s65_s22 }
  0x25   :  { %s880_s23 = scalar_lea.vmem %s66_s22, 128  ;;  %p885_p2 = scmp.lt.s32.totalorder %s66_s22, %s66_s22 }
  0x26   :  { %p881_p1 = scmp.ne.s32.totalorder %s66_s22, %s880_s23  ;;  %p886_p3 = scmp.lt.s32.totalorder %s880_s23, %s880_s23 }
  0x28   :  { %p887_p4 = por %p886_p3, %p885_p2 }
  0x2a   :  { %p888_p5 = pnand %p887_p4, %p881_p1 }
  0x2c   :  { %891 = shalt.err (!%p888_p5)
}
  0x2d   :  { %68 = dma.hbm_to_vmem [thread:$0]  %s1122_s7, 128, %s66_s22, [#allocation9]  }
  0x2e   :  { %912 = dma.done.wait [#allocation3], 256  }
  0x2f   :  { %913 = vsyncadd [#allocation3], 4294967040 }
  0x30   :  { %914 = dma.done.wait [#allocation6], 1024  }
  0x31   :  { %915 = vsyncadd [#allocation6], 4294966272 }
  0x32   :  { %916 = dma.done.wait [#allocation9], 128  }
  0x33   :  { %917 = vsyncadd [#allocation9], 4294967168  ;;  %v926_v0 = vmov 0.0   ;;  %v927_v1 = vmov 0   ;;  %v88_v2 = vld [vmem:[%s1115_s0 + $0x38] sm:$0xff]  ;;  %v87_v3 = vld [vmem:[%s1115_s0 + $0x30] sm:$0xff] }
  0x34   :  { %204 = vmatprep.mubr.f32.mxu0 %v926_v0  ;;  %770 = vset.pattern.permute.xlu0 %v927_v1  ;;  %v86_v4 = vld [vmem:[%s1115_s0 + $0x28] sm:$0xff]  ;;  %v85_v5 = vld [vmem:[%s1115_s0 + $0x20] sm:$0xff]  ;;  %v84_v6 = vld [vmem:[%s1115_s0 + $0x18] sm:$0xff]  ;;  %vm127_vm0 = vcmask 261120   ;;  %vm506_vm2 = vcmask 64512  }
  0x35   :  { %771 = vset.pattern.permute.xlu1 %v927_v1  ;;  %337 = vmatprep.mubr.f32.mxu1 %v926_v0  ;;  %v83_v7 = vld [vmem:[%s1115_s0 + $0x10] sm:$0xff]  ;;  %v82_v8 = vld [vmem:[%s1115_s0 + $0x8] sm:$0xff]  ;;  %v94_v9 = vld [vmem:[%s1120_s5 + $0x18] sm:$0xff] }
  0x36   :  { %164 = vmatprep.subr.mxu0 %v88_v2  ;;  %v92_v10 = vld [vmem:[%s1120_s5 + $0x8] sm:$0xff]  ;;  %v81_v11 = vld [vmem:[%s1115_s0] sm:$0xff]  ;;  %124 = vperm.xlu0 %770, %v94_v9   ;;  %v93_v13 = vld [vmem:[%s1120_s5 + $0x10] sm:$0xff] }
  0x37   :  { %165 = vmatpush1.msra.mxu0 %v87_v3  ;;  %v103_v12 = vld [vmem:[%s1117_s2] sm:$0xff]  ;;  %114 = vperm.xlu1 %771, %v92_v10   ;;  %v104_v15 = vld [vmem:[%s1117_s2 + $0x8] sm:$0xff]  ;;  %v98_v16 = vld [vmem:[%s1120_s5 + $0x38] sm:$0xff] }
  0x38   :  { %166 = vmatprep.subr.mxu0 %v86_v4  ;;  %v91_v14 = vld [vmem:[%s1120_s5] sm:$0xff]  ;;  %v97_v17 = vld [vmem:[%s1120_s5 + $0x30] sm:$0xff]  ;;  %v96_v19 = vld [vmem:[%s1120_s5 + $0x28] sm:$0xff] }
  0x39   :  { %167 = vmatpush1.msra.mxu0 %v85_v5  ;;  %v105_v18 = vld [vmem:[%s1117_s2 + $0x10] sm:$0xff]  ;;  %v95_v20 = vld [vmem:[%s1120_s5 + $0x20] sm:$0xff]  ;;  %v106_v21 = vld [vmem:[%s1117_s2 + $0x18] sm:$0xff] }
  0x3a   :  { %168 = vmatprep.subr.mxu0 %v84_v6  ;;  %119 = vperm.xlu0 %770, %v93_v13   ;;  %v100_v22 = vld [vmem:[%s1120_s5 + $0x48] sm:$0xff]  ;;  %v102_v23 = vld [vmem:[%s1120_s5 + $0x58] sm:$0xff]  ;;  %v101_v24 = vld [vmem:[%s1120_s5 + $0x50] sm:$0xff] }
  0x3b   :  { %169 = vmatpush1.msra.mxu0 %v83_v7  ;;  %109 = vperm.xlu1 %771, %v91_v14   ;;  %v99_v25 = vld [vmem:[%s1120_s5 + $0x40] sm:$0xff]  ;;  %v237_v53 = vld [vmem:[#allocation5] sm:$0xff]  ;;  %v238_v55 = vld [vmem:[#allocation5 + $0x8] sm:$0xff] }
  0x3c   :  { %170 = vmatprep.subr.mxu0 %v82_v8  ;;  %v239_v56 = vld [vmem:[#allocation5 + $0x10] sm:$0xff]  ;;  %v240_v57 = vld [vmem:[#allocation5 + $0x18] sm:$0xff] }
  0x3d   :  { %171 = vmatpush1.msra.mxu0 %v81_v11 }
  0x3e   :  { %738 = vmatmul.mubr.msk.f32.vlgmr.msra.gmra.mxu0 %vm127_vm0, %v103_v12  ;;  %258 = vperm.xlu0 %770, %v98_v16  }
  0x3f   :  { %210 = vmatprep.mubr.f32.mxu0 %v926_v0  ;;  %253 = vperm.xlu1 %771, %v97_v17  }
  0x42   :  { %739 = vmatmul.mubr.msk.f32.gmra.mxu0 %vm127_vm0, %v104_v15  ;;  %248 = vperm.xlu0 %770, %v96_v19  }
  0x43   :  { %216 = vmatprep.mubr.f32.mxu0 %v926_v0  ;;  %243 = vperm.xlu1 %771, %v95_v20  }
  0x46   :  { %740 = vmatmul.mubr.msk.f32.gmra.mxu0 %vm127_vm0, %v105_v18  ;;  %381 = vperm.xlu0 %770, %v100_v22   ;;  %v370_v22 = vld [vmem:[#allocation7] sm:$0xff] }
  0x47   :  { %222 = vmatprep.mubr.f32.mxu0 %v926_v0  ;;  %391 = vperm.xlu1 %771, %v102_v23   ;;  %v373_v23 = vld [vmem:[#allocation7 + $0x18] sm:$0xff] }
  0x4a   :  { %741 = vmatmul.mubr.msk.f32.gmra.mxu0 %vm127_vm0, %v106_v21  ;;  %386 = vperm.xlu0 %770, %v101_v24  }
  0x4b   :  { %470 = vmatprep.mubr.f32.mxu0 %v926_v0  ;;  %376 = vperm.xlu1 %771, %v99_v25   ;;  %v371_v25 = vld [vmem:[#allocation7 + $0x8] sm:$0xff] }
  0xb1   :  { %v125_v30 = vpop.permute.xlu0 %124 }
  0xb2   :  { %v115_v33 = vpop.permute.xlu1 %114 }
  0xb5   :  { %v120_v35 = vpop.permute.xlu0 %119 }
  0xb6   :  { %v110_v41 = vpop.permute.xlu1 %109 }
  0xb9   :  { %v259_v63 = vpop.permute.xlu0 %258 }
  0xba   :  { %v254_v2 = vpop.permute.xlu1 %253 }
  0xbd   :  { %v249_v8 = vpop.permute.xlu0 %248 }
  0xbe   :  { %v244_v11 = vpop.permute.xlu1 %243 }
  0xfe   :  { %v206_v26 = vpop.f32.mrf.mxu0 }
  0xff   :  { %v207_v45 = vadd.f32 %v206_v26, %v110_v41  ;;  %v372_v26 = vld [vmem:[#allocation7 + $0x10] sm:$0xff] }
 0x100   :  { %v208_v27 = vpop.f32.mrf.mxu0 }
 0x101   :  { %v209_v44 = vadd.f32 %v208_v27, %v110_v41  ;;  %v928_v27 = vmov 1966171168  }
 0x102   :  { %v212_v28 = vpop.f32.mrf.mxu0 }
 0x103   :  { %v213_v43 = vadd.f32 %v212_v28, %v115_v33  ;;  %v682_v28 = vunpack.c.l.s4 %v928_v27 }
 0x104   :  { %v214_v29 = vpop.f32.mrf.mxu0 }
 0x105   :  { %v215_v42 = vadd.f32 %v214_v29, %v115_v33  ;;  %v684_v29 = vlaneseq }
 0x106   :  { %v218_v31 = vpop.f32.mrf.mxu0 }
 0x107   :  { %v219_v40 = vadd.f32 %v218_v31, %v120_v35  ;;  %v683_v31 = vunpack.c.0.s8 %v682_v28  ;;  %vm1093_vm1 = vcmp.lt.s32.totalorder %v684_v29, 256 }
 0x108   :  { %v220_v32 = vpop.f32.mrf.mxu0 }
 0x109   :  { %v221_v38 = vadd.f32 %v220_v32, %v120_v35  ;;  %v685_v32 = vshrl.u32 %v684_v29, 7 }
 0x10a   :  { %v224_v34 = vpop.f32.mrf.mxu0 }
 0x10b   :  { %v225_v36 = vadd.f32 %v224_v34, %v125_v30 }
 0x10c   :  { %v226_v37 = vpop.f32.mrf.mxu0 }
 0x10d   :  { %v227_v39 = vadd.f32 %v226_v37, %v125_v30  ;;  %v392_v30 = vpop.permute.xlu1 %391 }
 0x10f   :  { %772 = vtanh.f32 %v227_v39  ;;  %v382_v39 = vpop.permute.xlu0 %381 }
 0x110   :  { %774 = vtanh.f32 %v225_v36 }
 0x111   :  { %776 = vtanh.f32 %v221_v38  ;;  %v377_v34 = vpop.permute.xlu1 %376  ;;  %v1088_v38 = vsub.s32 %v683_v31, %v685_v32 }
 0x112   :  { %778 = vtanh.f32 %v219_v40 }
 0x113   :  { %780 = vtanh.f32 %v215_v42 }
 0x114   :  { %782 = vtanh.f32 %v213_v43 }
 0x115   :  { %784 = vtanh.f32 %v209_v44 }
 0x116   :  { %786 = vtanh.f32 %v207_v45 }
 0x11c   :  { %v773_v46 = vpop.eup %772 }
 0x11d   :  { %v775_v47 = vpop.eup %774  ;;  %297 = vmatprep.subr.mxu1 %v773_v46 }
 0x11e   :  { %v777_v48 = vpop.eup %776  ;;  %298 = vmatpush1.msra.mxu1 %v775_v47 }
 0x11f   :  { %v779_v49 = vpop.eup %778  ;;  %299 = vmatprep.subr.mxu1 %v777_v48  ;;  %v90_v48 = vld [vmem:[#allocation2 + $0x8] sm:$0xff] }
 0x120   :  { %v781_v50 = vpop.eup %780  ;;  %300 = vmatpush1.msra.mxu1 %v779_v49 }
 0x121   :  { %v783_v51 = vpop.eup %782  ;;  %301 = vmatprep.subr.mxu1 %v781_v50  ;;  %v89_v50 = vld [vmem:[#allocation2] sm:$0xff] }
 0x122   :  { %v785_v52 = vpop.eup %784  ;;  %302 = vmatpush1.msra.mxu1 %v783_v51 }
 0x123   :  { %v787_v54 = vpop.eup %786  ;;  %303 = vmatprep.subr.mxu1 %v785_v52 }
 0x124   :  { %304 = vmatpush1.msra.mxu1 %v787_v54  ;;  %v505_v54 = vld [vmem:[%s1121_s6] sm:$0xff]  ;;  %s929_s6 = smov [#allocation10]  }
 0x125   :  { %742 = vmatmul.mubr.msk.f32.vlgmr.msra.gmra.mxu1 %vm127_vm0, %v237_v53  ;;  %s727_s21 = sshll.u32 %s929_s6, 4  ;;  %s728_s21 = int_to_ptr.vmem [resolvable:$true] %s727_s21 }
 0x126   :  { %343 = vmatprep.mubr.f32.mxu1 %v926_v0  ;;  %s892_s22 = scalar_lea.vmem %s728_s21, 64  ;;  %p897_p7 = scmp.lt.s32.totalorder %s728_s21, %s728_s21 }
 0x127   :  { %p893_p6 = scmp.ne.s32.totalorder %s728_s21, %s892_s22  ;;  %p898_p8 = scmp.lt.s32.totalorder %s892_s22, %s892_s22 }
 0x129   :  { %743 = vmatmul.mubr.msk.f32.gmra.mxu1 %vm127_vm0, %v238_v55  ;;  %p899_p9 = por %p898_p8, %p897_p7 }
 0x12a   :  { %349 = vmatprep.mubr.f32.mxu1 %v926_v0 }
 0x12b   :  { %p900_p10 = pnand %p899_p9, %p893_p6 }
 0x12d   :  { %744 = vmatmul.mubr.msk.f32.gmra.mxu1 %vm127_vm0, %v239_v56 }
 0x12e   :  { %355 = vmatprep.mubr.f32.mxu1 %v926_v0 }
 0x131   :  { %745 = vmatmul.mubr.msk.f32.gmra.mxu1 %vm127_vm0, %v240_v57 }
 0x132   :  { %488 = vmatprep.mubr.f32.mxu1 %v926_v0 }
 0x1e5   :  { %v339_v58 = vpop.f32.mrf.mxu1 }
 0x1e6   :  { %v340_v14 = vadd.f32 %v339_v58, %v244_v11 }
 0x1e7   :  { %v341_v59 = vpop.f32.mrf.mxu1 }
 0x1e8   :  { %v342_v13 = vadd.f32 %v341_v59, %v244_v11 }
 0x1e9   :  { %v345_v60 = vpop.f32.mrf.mxu1 }
 0x1ea   :  { %v346_v12 = vadd.f32 %v345_v60, %v249_v8 }
 0x1eb   :  { %v347_v61 = vpop.f32.mrf.mxu1 }
 0x1ec   :  { %v348_v10 = vadd.f32 %v347_v61, %v249_v8 }
 0x1ed   :  { %v351_v62 = vpop.f32.mrf.mxu1 }
 0x1ee   :  { %v352_v9 = vadd.f32 %v351_v62, %v254_v2 }
 0x1ef   :  { %v353_v1 = vpop.f32.mrf.mxu1 }
 0x1f0   :  { %v354_v6 = vadd.f32 %v353_v1, %v254_v2  ;;  %v387_v2 = vpop.permute.xlu0 %386 }
 0x1f1   :  { %v357_v3 = vpop.f32.mrf.mxu1 }
 0x1f2   :  { %v358_v4 = vadd.f32 %v357_v3, %v259_v63 }
 0x1f3   :  { %v359_v5 = vpop.f32.mrf.mxu1 }
 0x1f4   :  { %v360_v7 = vadd.f32 %v359_v5, %v259_v63  ;;  %v581_v63 = vld [vmem:[#allocation8] sm:$0xff] }
 0x1f6   :  { %788 = vtanh.f32 %v360_v7 }
 0x1f7   :  { %790 = vtanh.f32 %v358_v4 }
 0x1f8   :  { %792 = vtanh.f32 %v354_v6 }
 0x1f9   :  { %794 = vtanh.f32 %v352_v9 }
 0x1fa   :  { %796 = vtanh.f32 %v348_v10 }
 0x1fb   :  { %798 = vtanh.f32 %v346_v12 }
 0x1fc   :  { %800 = vtanh.f32 %v342_v13 }
 0x1fd   :  { %802 = vtanh.f32 %v340_v14 }
 0x203   :  { %v789_v15 = vpop.eup %788 }
 0x204   :  { %v791_v16 = vpop.eup %790  ;;  %430 = vmatprep.subr.mxu0 %v789_v15  ;;  %752 = vmatprep.subr.mxu1 %v789_v15 }
 0x205   :  { %v793_v17 = vpop.eup %792  ;;  %431 = vmatpush1.msra.mxu0 %v791_v16  ;;  %756 = vmatpush1.msra.mxu1 %v791_v16 }
 0x206   :  { %v795_v18 = vpop.eup %794  ;;  %432 = vmatprep.subr.mxu0 %v793_v17  ;;  %753 = vmatprep.subr.mxu1 %v793_v17 }
 0x207   :  { %v797_v19 = vpop.eup %796  ;;  %433 = vmatpush1.msra.mxu0 %v795_v18  ;;  %757 = vmatpush1.msra.mxu1 %v795_v18 }
 0x208   :  { %v799_v20 = vpop.eup %798  ;;  %434 = vmatprep.subr.mxu0 %v797_v19  ;;  %754 = vmatprep.subr.mxu1 %v797_v19 }
 0x209   :  { %v801_v21 = vpop.eup %800  ;;  %435 = vmatpush1.msra.mxu0 %v799_v20  ;;  %758 = vmatpush1.msra.mxu1 %v799_v20 }
 0x20a   :  { %v803_v24 = vpop.eup %802  ;;  %436 = vmatprep.subr.mxu0 %v801_v21  ;;  %755 = vmatprep.subr.mxu1 %v801_v21 }
 0x20b   :  { %437 = vmatpush1.msra.mxu0 %v803_v24  ;;  %759 = vmatpush1.msra.mxu1 %v803_v24 }
 0x20c   :  { %746 = vmatmul.mubr.msk.f32.vlgmr.msra.gmra.mxu0 %vm127_vm0, %v370_v22  ;;  %749 = vmatmul.mubr.msk.f32.vlgmr.msra.gmra.mxu1 %vm127_vm0, %v373_v23 }
 0x20d   :  { %476 = vmatprep.mubr.f32.mxu0 %v926_v0  ;;  %574 = vmatprep.mubr.f32.mxu1 %v926_v0 }
 0x210   :  { %747 = vmatmul.mubr.msk.f32.gmra.mxu0 %vm127_vm0, %v371_v25 }
 0x211   :  { %482 = vmatprep.mubr.f32.mxu0 %v926_v0 }
 0x214   :  { %748 = vmatmul.mubr.msk.f32.gmra.mxu0 %vm127_vm0, %v372_v26 }
 0x2cc   :  { %v472_v33 = vpop.f32.mrf.mxu0  ;;  %v490_v55 = vpop.f32.mrf.mxu1 }
 0x2cd   :  { %v1084_v36 = vadd.f32 %v472_v33, %v377_v34  ;;  %v491_v59 = vadd.f32 %v490_v55, %v392_v30 }
 0x2ce   :  { %v474_v35 = vpop.f32.mrf.mxu0  ;;  %v492_v56 = vpop.f32.mrf.mxu1 }
 0x2cf   :  { %v1086_v37 = vadd.f32 %v474_v35, %v377_v34  ;;  %v493_v58 = vadd.f32 %v492_v56, %v392_v30 }
 0x2d0   :  { %v478_v40 = vpop.f32.mrf.mxu0 }
 0x2d1   :  { %v703_v41 = vcombine.low %v1084_v36, %v1086_v37  ;;  %v479_v42 = vadd.f32 %v478_v40, %v382_v39 }
 0x2d2   :  { %v480_v43 = vpop.f32.mrf.mxu0 }
 0x2d3   :  { %v710_v44 = vrot.slane %v703_v41, %v1088_v38  ;;  %v481_v45 = vadd.f32 %v480_v43, %v382_v39  ;;  %804 = vtanh.f32 %v479_v42 }
 0x2d4   :  { %v484_v1 = vpop.f32.mrf.mxu0 }
 0x2d5   :  { %v717_v47 = vrot.slane %v710_v44, %v1088_v38  ;;  %806 = vtanh.f32 %v481_v45  ;;  %v485_v4 = vadd.f32 %v484_v1, %v387_v2 }
 0x2d6   :  { %v486_v3 = vpop.f32.mrf.mxu0 }
 0x2d7   :  { %720 = vst.msk [vmem:[#allocation10 + $0x1] ss:$2 sm:$0x3] %vm1093_vm1, %v717_v47  ;;  %v487_v5 = vadd.f32 %v486_v3, %v387_v2  ;;  %v497_v6 = vmul.f32 1.442695, %v485_v4 }
 0x2d9   :  { %808 = vpow2.f32 %v497_v6 }
 0x2e0   :  { %v805_v49 = vpop.eup %804 }
 0x2e1   :  { %v501_v53 = vsub.f32 %v89_v50, %v805_v49 }
 0x2e2   :  { %v807_v51 = vpop.eup %806 }
 0x2e3   :  { %v502_v52 = vsub.f32 %v90_v48, %v807_v51 }
 0x2e5   :  { %540 = vmatprep.subr.mxu1 %v502_v52 }
 0x2e6   :  { %541 = vmatpush1.msra.mxu1 %v501_v53  ;;  %v809_v7 = vpop.eup %808 }
 0x2e7   :  { %750 = vmatmul.mubr.msk.f32.vlgmr.msra.gmra.mxu1 %vm506_vm2, %v505_v54  ;;  %v503_v9 = vmul.f32 %v809_v7, %v501_v53 }
 0x2e8   :  { %651 = vmatprep.mubr.f32.mxu1 %v926_v0  ;;  %v499_v0 = vmul.f32 1.442695, %v487_v5 }
 0x2ea   :  { %810 = vpow2.f32 %v499_v0 }
 0x2f7   :  { %v811_v8 = vpop.eup %810 }
 0x2f8   :  { %v504_v12 = vmul.f32 %v811_v8, %v502_v52 }
 0x3a7   :  { %v576_v57 = vpop.f32.mrf.mxu1 }
 0x3a8   :  { %v582_v62 = vmul.f32 %v576_v57, %v491_v59 }
 0x3a9   :  { %v578_v60 = vpop.f32.mrf.mxu1 }
 0x3aa   :  { %v583_v61 = vmul.f32 %v578_v60, %v493_v58 }
 0x3ac   :  { %617 = vmatprep.subr.mxu1 %v583_v61 }
 0x3ad   :  { %618 = vmatpush1.msra.mxu1 %v582_v62 }
 0x3ae   :  { %751 = vmatmul.mubr.msk.f32.vlgmr.msra.gmra.mxu1 %vm506_vm2, %v581_v63 }
 0x46e   :  { %v653_v10 = vpop.f32.mrf.mxu1 }
 0x46f   :  { %v658_v11 = vadd.f32 %v653_v10, %v503_v9 }
 0x470   :  { %v655_v13 = vpop.f32.mrf.mxu1 }
 0x471   :  { %v660_v14 = vmul.f32 %v658_v11, %v658_v11  ;;  %v659_v15 = vadd.f32 %v655_v13, %v504_v12 }
 0x473   :  { %v662_v16 = vrot.slane %v660_v14, 4  ;;  %v661_v17 = vmul.f32 %v659_v15, %v659_v15 }
 0x475   :  { %v663_v18 = vadd.f32 %v662_v16, %v660_v14  ;;  %v668_v19 = vrot.slane %v661_v17, 4 }
 0x477   :  { %v664_v20 = vrot.slane %v663_v18, 2  ;;  %v669_v21 = vadd.f32 %v668_v19, %v661_v17 }
 0x479   :  { %v665_v22 = vadd.f32 %v664_v20, %v663_v18  ;;  %v670_v23 = vrot.slane %v669_v21, 2 }
 0x47b   :  { %v666_v24 = vrot.slane %v665_v22, 1  ;;  %v671_v25 = vadd.f32 %v670_v23, %v669_v21 }
 0x47d   :  { %v667_v26 = vadd.f32 %v666_v24, %v665_v22  ;;  %v672_v27 = vrot.slane %v671_v25, 1 }
 0x47f   :  { %v674_v28 = vmul.f32 0.5, %v667_v26  ;;  %v673_v29 = vadd.f32 %v672_v27, %v671_v25 }
 0x481   :  { %v675_v30 = vmul.f32 0.5, %v673_v29  ;;  %v676_v31 = vsub.f32 %v1084_v36, %v674_v28 }
 0x483   :  { %v677_v32 = vsub.f32 %v1086_v37, %v675_v30 }
 0x485   :  { %v680_v33 = vcombine.low %v676_v31, %v677_v32 }
 0x487   :  { %v687_v34 = vrot.slane %v680_v33, %v1088_v38 }
 0x489   :  { %v694_v35 = vrot.slane %v687_v34, %v1088_v38 }
 0x48b   :  { %700 = vst.msk [vmem:[#allocation10] ss:$2 sm:$0x3] %vm1093_vm1, %v694_v35 }
 0x48c   :  { %903 = shalt.err (!%p900_p10)
}
 0x48d   :  { %730 = dma.vmem_to_hbm [thread:$0]  %s728_s21, 64, %s1123_s8, [#allocation4]  }
 0x48e   :  { %918 = dma.done.wait [#allocation4], 64  }
 0x48f   :  { %919 = vsyncadd [#allocation4], 4294967232 }
 0x490   :  { %734 = vsyncpa [#allocation3], 1 }
 0x491   :  { %735 = vsyncpa [#allocation6], 1 }
 0x492   :  { %736 = vsyncpa [#allocation9], 1 }
 0x493   :  { %737 = vsyncpa [#allocation4], 1 }

</bundles_post_ra>
